<compile_context>
chip_gen: v7x
topology: tpu7x:2x2x1
jax: 0.10.0
libtpu: 0.0.40
codegen_flags: <defaults>
</compile_context>

<pallas_src>
import math

import jax
import jax.numpy as jnp
from jax.experimental import pallas as pl
from jax.experimental.pallas import tpu as pltpu


# ---------------------------------------------------------------------------
# Kernel
# ---------------------------------------------------------------------------
def _gated_merge_kernel(x_ref, y_ref, rel_ref, gate_ref, wg_ref, bg_ref,
                        wp1_ref, bp1_ref, lnp_g_ref, lnp_b_ref,
                        wp2_ref, bp2_ref,
                        w1_ref, b1_ref, w2_ref, b2_ref,
                        n2_g_ref, n2_b_ref, n3_g_ref, n3_b_ref,
                        out_ref):
    f32 = jnp.float32
    bf16 = jnp.bfloat16

    def layer_norm(z, gamma, beta):
        # One-pass stats (mean and mean(z^2) reduced together) shorten the
        # reduce->sub->reduce chain that competes with MXU pushes for the
        # vector-extended slot; rsqrt goes to the EUP.
        mu = jnp.mean(z, axis=-1, keepdims=True)
        ms = jnp.mean(z * z, axis=-1, keepdims=True)
        var = jnp.maximum(ms - mu * mu, 0.0)
        inv = jax.lax.rsqrt(var + 1e-5)
        return (z - mu) * inv * gamma + beta

    x = x_ref[...].astype(f32)                                # (TM, E)
    yb = y_ref[...].astype(f32) + rel_ref[...].astype(f32)    # y.unsqueeze(-1) + rel_pos

    # proj_layer: Linear -> LayerNorm -> ReLU -> Linear   (bf16 MXU, f32 accumulate)
    h = jnp.dot(yb.astype(bf16), wp1_ref[...], preferred_element_type=f32) + bp1_ref[...]
    h = jnp.maximum(layer_norm(h, lnp_g_ref[...], lnp_b_ref[...]), 0.0)
    feat = jnp.dot(h.astype(bf16), wp2_ref[...], preferred_element_type=f32) + bp2_ref[...]

    # gate_layer: per-view (8, E) slice of Linear(8, 4*E) + Sigmoid; the view's
    # weight/bias block is selected by the grid index_map, so the LHS stays (TM, 8).
    g = jax.nn.sigmoid(
        jnp.dot(gate_ref[...].astype(bf16), wg_ref[...], preferred_element_type=f32)
        + bg_ref[...])

    # TODO(synk): dropout / dropout2 / dropout3 are identity (inference); training-mode
    # stochastic dropout is not implemented.
    z = layer_norm(x + feat * g, n2_g_ref[...], n2_b_ref[...])

    # FFN: linear1 -> ReLU -> linear2, residual, norm3
    f = jnp.maximum(
        jnp.dot(z.astype(bf16), w1_ref[...], preferred_element_type=f32) + b1_ref[...], 0.0)
    f = jnp.dot(f.astype(bf16), w2_ref[...], preferred_element_type=f32) + b2_ref[...]
    z = layer_norm(z + f, n3_g_ref[...], n3_b_ref[...])

    out_ref[...] = z.astype(out_ref.dtype)


# ---------------------------------------------------------------------------
# Parameter-only preprocessing (hoisted out of the per-call path)
# ---------------------------------------------------------------------------
def prepare_params(params, mxu_dtype=jnp.bfloat16):
    E = params["proj_w1"].shape[0]
    W = params["gate_w"].shape[0] // E
    row = lambda v: v.reshape(1, -1).astype(jnp.float32)
    return {
        "wp1": params["proj_w1"].T.astype(mxu_dtype),          # (E, E)
        "bp1": row(params["proj_b1"]),
        "lnp_g": row(params["proj_ln_g"]),
        "lnp_b": row(params["proj_ln_b"]),
        "wp2": params["proj_w2"].T.astype(mxu_dtype),          # (E, E)
        "bp2": row(params["proj_b2"]),
        # gate Linear(8, 4E) split into one (8, E) weight block + (1, E) bias per view.
        "wg": params["gate_w"].reshape(W, E, 8).transpose(0, 2, 1).astype(mxu_dtype),
        "bg": params["gate_b"].reshape(W, 1, E).astype(jnp.float32),
        "w1": params["lin1_w"].T.astype(mxu_dtype),            # (E, F)
        "b1": row(params["lin1_b"]),
        "w2": params["lin2_w"].T.astype(mxu_dtype),            # (F, E)
        "b2": row(params["lin2_b"]),
        "n2_g": row(params["norm2_g"]), "n2_b": row(params["norm2_b"]),
        "n3_g": row(params["norm3_g"]), "n3_b": row(params["norm3_b"]),
    }


# ---------------------------------------------------------------------------
# Wrapper
# ---------------------------------------------------------------------------
def gated_merge_pallas(x, y, rel_pos, gate, prep, *, tile_rows=512):
    """x: (B, E, H, W=4), y: (B, E, H), rel_pos: (B, E, H, W), gate: (B, H, 8).
    Returns (B, E, H, W)."""
    B, E, H, W = x.shape
    Wg, _, Eg = prep["wg"].shape
    assert W == Wg, "gate_layer = Linear(8, 4*E) implies exactly 4 'views' on the W axis"
    assert E == Eg and gate.shape == (B, H, 8)
    Mg = B * H

    # ---- layout plumbing only (module interface is channel-first) ----
    # Present lane-dense (W, Mg, E) slabs; rows ordered (b, h) with E on lanes.
    x_v = jnp.transpose(x, (3, 0, 2, 1)).reshape(W, Mg, E)
    rel_v = jnp.transpose(rel_pos, (3, 0, 2, 1)).reshape(W, Mg, E)
    y_rows = jnp.transpose(y, (0, 2, 1)).reshape(Mg, E)
    gate_rows = gate.reshape(Mg, 8)

    # Row tile: prefer >= 256 for MXU occupancy; capped so tiles + intermediates
    # stay well inside v7x's 32 MiB scoped-VMEM default.
    if Mg <= tile_rows:
        TM = Mg
    else:
        TM = max(8, (tile_rows // 8) * 8)
    n_tiles = pl.cdiv(Mg, TM)

    tile_map = lambda i, w: (w, i, 0)     # per-(row-tile, view) blocks
    row_map = lambda i, w: (i, 0)         # block idx constant across inner w steps -> reused
    view_map = lambda i, w: (w, 0, 0)     # per-view gate weight / bias
    const_map = lambda i, w: (0, 0)       # VMEM-resident weights
    full = lambda a: pl.BlockSpec(a.shape, const_map)

    operands = [
        (x_v, pl.BlockSpec((None, TM, E), tile_map)),
        (y_rows, pl.BlockSpec((TM, E), row_map)),
        (rel_v, pl.BlockSpec((None, TM, E), tile_map)),
        (gate_rows, pl.BlockSpec((TM, 8), row_map)),
        (prep["wg"], pl.BlockSpec((None, 8, E), view_map)),
        (prep["bg"], pl.BlockSpec((None, 1, E), view_map)),
    ] + [(prep[k], full(prep[k])) for k in
         ("wp1", "bp1", "lnp_g", "lnp_b", "wp2", "bp2",
          "w1", "b1", "w2", "b2", "n2_g", "n2_b", "n3_g", "n3_b")]

    out_v = pl.pallas_call(
        _gated_merge_kernel,
        out_shape=jax.ShapeDtypeStruct((W, Mg, E), x.dtype),
        grid=(n_tiles, W),
        in_specs=[spec for _, spec in operands],
        out_specs=pl.BlockSpec((None, TM, E), tile_map),
        compiler_params=pltpu.CompilerParams(
            dimension_semantics=("parallel", "parallel")),
    )(*[a for a, _ in operands])

    # back to the module's (B, E, H, W) interface
    return jnp.transpose(out_v.reshape(W, B, H, E), (1, 3, 2, 0))


# ---------------------------------------------------------------------------
# Pure-JAX reference (mirrors the PyTorch forward, eval mode)
# ---------------------------------------------------------------------------
def _layer_norm_ref(z, gamma, beta, eps=1e-5):
    mu = jnp.mean(z, axis=-1, keepdims=True)
    var = jnp.mean((z - mu) ** 2, axis=-1, keepdims=True)
    return (z - mu) / jnp.sqrt(var + eps) * gamma + beta


def _reference_gated_merge(x, y, rel_pos, gate, params):
    xp = jnp.transpose(x, (0, 2, 3, 1))                    # (B, H, W, E)
    yb = y[..., None] + rel_pos
    yb = jnp.transpose(yb, (0, 2, 3, 1))                   # (B, H, W, E)

    h = yb @ params["proj_w1"].T + params["proj_b1"]
    h = _layer_norm_ref(h, params["proj_ln_g"], params["proj_ln_b"])
    h = jnp.maximum(h, 0.0)
    feat = h @ params["proj_w2"].T + params["proj_b2"]

    g = jax.nn.sigmoid(gate @ params["gate_w"].T + params["gate_b"])
    g = g.reshape(yb.shape)

    z = xp + feat * g
    z = _layer_norm_ref(z, params["norm2_g"], params["norm2_b"])
    f = jnp.maximum(z @ params["lin1_w"].T + params["lin1_b"], 0.0)
    f = f @ params["lin2_w"].T + params["lin2_b"]
    z = z + f
    z = _layer_norm_ref(z, params["norm3_g"], params["norm3_b"])
    return jnp.transpose(z, (0, 3, 1, 2))


def _init_params(key, embed_dim, ffn_channel):
    E, F = embed_dim, ffn_channel
    ks = jax.random.split(key, 10)

    def linear(kw, kb, fan_in, fan_out):
        bound = 1.0 / math.sqrt(fan_in)
        w = jax.random.uniform(kw, (fan_out, fan_in), jnp.float32, -bound, bound)
        b = jax.random.uniform(kb, (fan_out,), jnp.float32, -bound, bound)
        return w, b

    proj_w1, proj_b1 = linear(ks[0], ks[1], E, E)
    proj_w2, proj_b2 = linear(ks[2], ks[3], E, E)
    gate_w, gate_b = linear(ks[4], ks[5], 8, 4 * E)
    lin1_w, lin1_b = linear(ks[6], ks[7], E, F)
    lin2_w, lin2_b = linear(ks[8], ks[9], F, E)
    ones = jnp.ones((E,), jnp.float32)
    zeros = jnp.zeros((E,), jnp.float32)
    return {
        "proj_w1": proj_w1, "proj_b1": proj_b1,
        "proj_ln_g": ones, "proj_ln_b": zeros,
        "proj_w2": proj_w2, "proj_b2": proj_b2,
        "gate_w": gate_w, "gate_b": gate_b,
        "lin1_w": lin1_w, "lin1_b": lin1_b,
        "lin2_w": lin2_w, "lin2_b": lin2_b,
        "norm2_g": ones, "norm2_b": zeros,
        "norm3_g": ones, "norm3_b": zeros,
    }


if __name__ == "__main__":
    # Small shapes consistent with the module: embed_dim E=128 (lane-dense),
    # ffn_channel=256, batch B=2, H=16 positions, W=4 views (forced by Linear(8, 4E)).
    B, E, H, W = 2, 128, 16, 4
    FFN = 256

    root = jax.random.PRNGKey(0)
    kx, ky, kr, kg, kp = jax.random.split(root, 5)
    x = jax.random.normal(kx, (B, E, H, W), jnp.float32)
    y = jax.random.normal(ky, (B, E, H), jnp.float32)
    rel_pos = jax.random.normal(kr, (B, E, H, W), jnp.float32)
    gate = jax.random.normal(kg, (B, H, 8), jnp.float32)
    params = _init_params(kp, E, FFN)
    prep = prepare_params(params)           # param-only work, done once

    run = jax.jit(gated_merge_pallas)
    out = jax.block_until_ready(run(x, y, rel_pos, gate, prep))

    ref = _reference_gated_merge(x, y, rel_pos, gate, params)

    assert out.shape == (B, E, H, W)
    # bf16 MXU operands with f32 accumulation -> loosen the pure-f32 tolerance.
    max_err = float(jnp.max(jnp.abs(out - ref)))
    assert jnp.allclose(out, ref, atol=3e-2, rtol=3e-2), max_err

    print("KERNEL_OK")
</pallas_src>

<mosaic_0001>
module attributes {stable_mosaic.version = 11 : i64} {
  func.func @_gated_merge_kernel(%arg0: i32, %arg1: i32, %arg2: memref<1x32x128xf32, #tpu.memory_space<vmem>>, %arg3: memref<32x128xf32, #tpu.memory_space<vmem>>, %arg4: memref<1x32x128xf32, #tpu.memory_space<vmem>>, %arg5: memref<32x8xf32, #tpu.memory_space<vmem>>, %arg6: memref<1x8x128xbf16, #tpu.memory_space<vmem>>, %arg7: memref<1x1x128xf32, #tpu.memory_space<vmem>>, %arg8: memref<128x128xbf16, #tpu.memory_space<vmem>>, %arg9: memref<1x128xf32, #tpu.memory_space<vmem>>, %arg10: memref<1x128xf32, #tpu.memory_space<vmem>>, %arg11: memref<1x128xf32, #tpu.memory_space<vmem>>, %arg12: memref<128x128xbf16, #tpu.memory_space<vmem>>, %arg13: memref<1x128xf32, #tpu.memory_space<vmem>>, %arg14: memref<128x256xbf16, #tpu.memory_space<vmem>>, %arg15: memref<1x256xf32, #tpu.memory_space<vmem>>, %arg16: memref<256x128xbf16, #tpu.memory_space<vmem>>, %arg17: memref<1x128xf32, #tpu.memory_space<vmem>>, %arg18: memref<1x128xf32, #tpu.memory_space<vmem>>, %arg19: memref<1x128xf32, #tpu.memory_space<vmem>>, %arg20: memref<1x128xf32, #tpu.memory_space<vmem>>, %arg21: memref<1x128xf32, #tpu.memory_space<vmem>>, %arg22: memref<1x32x128xf32, #tpu.memory_space<vmem>>) attributes {dimension_semantics = [#tpu.dimension_semantics<parallel>, #tpu.dimension_semantics<parallel>], iteration_bounds = array<i64: 1, 4>, scalar_prefetch = 0 : i64, scratch_operands = 0 : i64, tpu.core_type = #tpu.core_type<tc>, window_params = [{transform_indices = @transform_0, window_bounds = array<i64: 1, 32, 128>}, {transform_indices = @transform_1, window_bounds = array<i64: 32, 128>}, {transform_indices = @transform_2, window_bounds = array<i64: 1, 32, 128>}, {transform_indices = @transform_3, window_bounds = array<i64: 32, 8>}, {transform_indices = @transform_4, window_bounds = array<i64: 1, 8, 128>}, {transform_indices = @transform_5, window_bounds = array<i64: 1, 1, 128>}, {pipeline_mode = #tpu.pipeline_mode<synchronous>, transform_indices = @transform_6, window_bounds = array<i64: 128, 128>}, {pipeline_mode = #tpu.pipeline_mode<synchronous>, transform_indices = @transform_7, window_bounds = array<i64: 1, 128>}, {pipeline_mode = #tpu.pipeline_mode<synchronous>, transform_indices = @transform_8, window_bounds = array<i64: 1, 128>}, {pipeline_mode = #tpu.pipeline_mode<synchronous>, transform_indices = @transform_9, window_bounds = array<i64: 1, 128>}, {pipeline_mode = #tpu.pipeline_mode<synchronous>, transform_indices = @transform_10, window_bounds = array<i64: 128, 128>}, {pipeline_mode = #tpu.pipeline_mode<synchronous>, transform_indices = @transform_11, window_bounds = array<i64: 1, 128>}, {pipeline_mode = #tpu.pipeline_mode<synchronous>, transform_indices = @transform_12, window_bounds = array<i64: 128, 256>}, {pipeline_mode = #tpu.pipeline_mode<synchronous>, transform_indices = @transform_13, window_bounds = array<i64: 1, 256>}, {pipeline_mode = #tpu.pipeline_mode<synchronous>, transform_indices = @transform_14, window_bounds = array<i64: 256, 128>}, {pipeline_mode = #tpu.pipeline_mode<synchronous>, transform_indices = @transform_15, window_bounds = array<i64: 1, 128>}, {pipeline_mode = #tpu.pipeline_mode<synchronous>, transform_indices = @transform_16, window_bounds = array<i64: 1, 128>}, {pipeline_mode = #tpu.pipeline_mode<synchronous>, transform_indices = @transform_17, window_bounds = array<i64: 1, 128>}, {pipeline_mode = #tpu.pipeline_mode<synchronous>, transform_indices = @transform_18, window_bounds = array<i64: 1, 128>}, {pipeline_mode = #tpu.pipeline_mode<synchronous>, transform_indices = @transform_19, window_bounds = array<i64: 1, 128>}, {transform_indices = @transform_20, window_bounds = array<i64: 1, 32, 128>}]} {
    %c0 = arith.constant 0 : index
    %c0_0 = arith.constant 0 : index
    %c0_1 = arith.constant 0 : index
    %0 = vector.load %arg2[%c0, %c0_0, %c0_1] : memref<1x32x128xf32, #tpu.memory_space<vmem>>, vector<1x32x128xf32>
    %1 = vector.shape_cast %0 : vector<1x32x128xf32> to vector<32x128xf32>
    %c0_2 = arith.constant 0 : index
    %c0_3 = arith.constant 0 : index
    %2 = vector.load %arg3[%c0_2, %c0_3] : memref<32x128xf32, #tpu.memory_space<vmem>>, vector<32x128xf32>
    %c0_4 = arith.constant 0 : index
    %c0_5 = arith.constant 0 : index
    %c0_6 = arith.constant 0 : index
    %3 = vector.load %arg4[%c0_4, %c0_5, %c0_6] : memref<1x32x128xf32, #tpu.memory_space<vmem>>, vector<1x32x128xf32>
    %4 = vector.shape_cast %3 : vector<1x32x128xf32> to vector<32x128xf32>
    %5 = arith.addf %2, %4 : vector<32x128xf32>
    %6 = arith.truncf %5 : vector<32x128xf32> to vector<32x128xbf16>
    %c0_7 = arith.constant 0 : index
    %c0_8 = arith.constant 0 : index
    %7 = vector.load %arg8[%c0_7, %c0_8] : memref<128x128xbf16, #tpu.memory_space<vmem>>, vector<128x128xbf16>
    %cst = arith.constant dense<0.000000e+00> : vector<32x128xf32>
    %8 = tpu.matmul %6, %7, %cst {dimension_numbers = #tpu.dot_dimension_numbers<[1], [0], [0], [1], [0, 0, 1, 1], [], []>} : vector<32x128xbf16>, vector<128x128xbf16>, vector<32x128xf32> -> vector<32x128xf32>
    %c0_9 = arith.constant 0 : index
    %c0_10 = arith.constant 0 : index
    %9 = vector.load %arg9[%c0_9, %c0_10] : memref<1x128xf32, #tpu.memory_space<vmem>>, vector<1x128xf32>
    %10 = vector.broadcast %9 : vector<1x128xf32> to vector<32x128xf32>
    %11 = arith.addf %8, %10 : vector<32x128xf32>
    %c0_11 = arith.constant 0 : index
    %c0_12 = arith.constant 0 : index
    %12 = vector.load %arg10[%c0_11, %c0_12] : memref<1x128xf32, #tpu.memory_space<vmem>>, vector<1x128xf32>
    %c0_13 = arith.constant 0 : index
    %c0_14 = arith.constant 0 : index
    %13 = vector.load %arg11[%c0_13, %c0_14] : memref<1x128xf32, #tpu.memory_space<vmem>>, vector<1x128xf32>
    %cst_15 = arith.constant dense<0.000000e+00> : vector<32xf32>
    %14 = vector.multi_reduction <add>, %11, %cst_15 [1] : vector<32x128xf32> to vector<32xf32>
    %15 = vector.shape_cast %14 : vector<32xf32> to vector<32x1xf32>
    %cst_16 = arith.constant 1.280000e+02 : f32
    %16 = vector.broadcast %cst_16 : f32 to vector<32x1xf32>
    %17 = arith.divf %15, %16 : vector<32x1xf32>
    %18 = arith.mulf %11, %11 : vector<32x128xf32>
    %cst_17 = arith.constant dense<0.000000e+00> : vector<32xf32>
    %19 = vector.multi_reduction <add>, %18, %cst_17 [1] : vector<32x128xf32> to vector<32xf32>
    %20 = vector.shape_cast %19 : vector<32xf32> to vector<32x1xf32>
    %cst_18 = arith.constant 1.280000e+02 : f32
    %21 = vector.broadcast %cst_18 : f32 to vector<32x1xf32>
    %22 = arith.divf %20, %21 : vector<32x1xf32>
    %23 = arith.mulf %17, %17 : vector<32x1xf32>
    %24 = arith.subf %22, %23 : vector<32x1xf32>
    %cst_19 = arith.constant 0.000000e+00 : f32
    %25 = vector.broadcast %cst_19 : f32 to vector<32x1xf32>
    %26 = arith.maximumf %24, %25 : vector<32x1xf32>
    %cst_20 = arith.constant 9.99999974E-6 : f32
    %27 = vector.broadcast %cst_20 : f32 to vector<32x1xf32>
    %28 = arith.addf %26, %27 : vector<32x1xf32>
    %29 = math.rsqrt %28 : vector<32x1xf32>
    %30 = vector.broadcast %17 : vector<32x1xf32> to vector<32x128xf32>
    %31 = arith.subf %11, %30 : vector<32x128xf32>
    %32 = vector.broadcast %29 : vector<32x1xf32> to vector<32x128xf32>
    %33 = arith.mulf %31, %32 : vector<32x128xf32>
    %34 = vector.broadcast %12 : vector<1x128xf32> to vector<32x128xf32>
    %35 = arith.mulf %33, %34 : vector<32x128xf32>
    %36 = vector.broadcast %13 : vector<1x128xf32> to vector<32x128xf32>
    %37 = arith.addf %35, %36 : vector<32x128xf32>
    %cst_21 = arith.constant 0.000000e+00 : f32
    %38 = vector.broadcast %cst_21 : f32 to vector<32x128xf32>
    %39 = arith.maximumf %37, %38 : vector<32x128xf32>
    %40 = arith.truncf %39 : vector<32x128xf32> to vector<32x128xbf16>
    %c0_22 = arith.constant 0 : index
    %c0_23 = arith.constant 0 : index
    %41 = vector.load %arg12[%c0_22, %c0_23] : memref<128x128xbf16, #tpu.memory_space<vmem>>, vector<128x128xbf16>
    %cst_24 = arith.constant dense<0.000000e+00> : vector<32x128xf32>
    %42 = tpu.matmul %40, %41, %cst_24 {dimension_numbers = #tpu.dot_dimension_numbers<[1], [0], [0], [1], [0, 0, 1, 1], [], []>} : vector<32x128xbf16>, vector<128x128xbf16>, vector<32x128xf32> -> vector<32x128xf32>
    %c0_25 = arith.constant 0 : index
    %c0_26 = arith.constant 0 : index
    %43 = vector.load %arg13[%c0_25, %c0_26] : memref<1x128xf32, #tpu.memory_space<vmem>>, vector<1x128xf32>
    %44 = vector.broadcast %43 : vector<1x128xf32> to vector<32x128xf32>
    %45 = arith.addf %42, %44 : vector<32x128xf32>
    %c0_27 = arith.constant 0 : index
    %c0_28 = arith.constant 0 : index
    %46 = vector.load %arg5[%c0_27, %c0_28] : memref<32x8xf32, #tpu.memory_space<vmem>>, vector<32x8xf32>
    %47 = arith.truncf %46 : vector<32x8xf32> to vector<32x8xbf16>
    %c0_29 = arith.constant 0 : index
    %c0_30 = arith.constant 0 : index
    %c0_31 = arith.constant 0 : index
    %48 = vector.load %arg6[%c0_29, %c0_30, %c0_31] : memref<1x8x128xbf16, #tpu.memory_space<vmem>>, vector<1x8x128xbf16>
    %49 = vector.shape_cast %48 : vector<1x8x128xbf16> to vector<8x128xbf16>
    %cst_32 = arith.constant dense<0.000000e+00> : vector<32x128xf32>
    %50 = tpu.matmul %47, %49, %cst_32 {dimension_numbers = #tpu.dot_dimension_numbers<[1], [0], [0], [1], [0, 0, 1, 1], [], []>} : vector<32x8xbf16>, vector<8x128xbf16>, vector<32x128xf32> -> vector<32x128xf32>
    %c0_33 = arith.constant 0 : index
    %c0_34 = arith.constant 0 : index
    %c0_35 = arith.constant 0 : index
    %51 = vector.load %arg7[%c0_33, %c0_34, %c0_35] : memref<1x1x128xf32, #tpu.memory_space<vmem>>, vector<1x1x128xf32>
    %52 = vector.shape_cast %51 : vector<1x1x128xf32> to vector<1x128xf32>
    %53 = vector.broadcast %52 : vector<1x128xf32> to vector<32x128xf32>
    %54 = arith.addf %50, %53 : vector<32x128xf32>
    %55 = arith.negf %54 : vector<32x128xf32>
    %56 = math.exp %55 : vector<32x128xf32>
    %cst_36 = arith.constant 1.000000e+00 : f32
    %57 = vector.broadcast %cst_36 : f32 to vector<32x128xf32>
    %58 = arith.addf %57, %56 : vector<32x128xf32>
    %59 = arith.divf %57, %58 : vector<32x128xf32>
    %60 = arith.mulf %45, %59 : vector<32x128xf32>
    %61 = arith.addf %1, %60 : vector<32x128xf32>
    %c0_37 = arith.constant 0 : index
    %c0_38 = arith.constant 0 : index
    %62 = vector.load %arg18[%c0_37, %c0_38] : memref<1x128xf32, #tpu.memory_space<vmem>>, vector<1x128xf32>
    %c0_39 = arith.constant 0 : index
    %c0_40 = arith.constant 0 : index
    %63 = vector.load %arg19[%c0_39, %c0_40] : memref<1x128xf32, #tpu.memory_space<vmem>>, vector<1x128xf32>
    %cst_41 = arith.constant dense<0.000000e+00> : vector<32xf32>
    %64 = vector.multi_reduction <add>, %61, %cst_41 [1] : vector<32x128xf32> to vector<32xf32>
    %65 = vector.shape_cast %64 : vector<32xf32> to vector<32x1xf32>
    %cst_42 = arith.constant 1.280000e+02 : f32
    %66 = vector.broadcast %cst_42 : f32 to vector<32x1xf32>
    %67 = arith.divf %65, %66 : vector<32x1xf32>
    %68 = arith.mulf %61, %61 : vector<32x128xf32>
    %cst_43 = arith.constant dense<0.000000e+00> : vector<32xf32>
    %69 = vector.multi_reduction <add>, %68, %cst_43 [1] : vector<32x128xf32> to vector<32xf32>
    %70 = vector.shape_cast %69 : vector<32xf32> to vector<32x1xf32>
    %cst_44 = arith.constant 1.280000e+02 : f32
    %71 = vector.broadcast %cst_44 : f32 to vector<32x1xf32>
    %72 = arith.divf %70, %71 : vector<32x1xf32>
    %73 = arith.mulf %67, %67 : vector<32x1xf32>
    %74 = arith.subf %72, %73 : vector<32x1xf32>
    %cst_45 = arith.constant 0.000000e+00 : f32
    %75 = vector.broadcast %cst_45 : f32 to vector<32x1xf32>
    %76 = arith.maximumf %74, %75 : vector<32x1xf32>
    %cst_46 = arith.constant 9.99999974E-6 : f32
    %77 = vector.broadcast %cst_46 : f32 to vector<32x1xf32>
    %78 = arith.addf %76, %77 : vector<32x1xf32>
    %79 = math.rsqrt %78 : vector<32x1xf32>
    %80 = vector.broadcast %67 : vector<32x1xf32> to vector<32x128xf32>
    %81 = arith.subf %61, %80 : vector<32x128xf32>
    %82 = vector.broadcast %79 : vector<32x1xf32> to vector<32x128xf32>
    %83 = arith.mulf %81, %82 : vector<32x128xf32>
    %84 = vector.broadcast %62 : vector<1x128xf32> to vector<32x128xf32>
    %85 = arith.mulf %83, %84 : vector<32x128xf32>
    %86 = vector.broadcast %63 : vector<1x128xf32> to vector<32x128xf32>
    %87 = arith.addf %85, %86 : vector<32x128xf32>
    %88 = arith.truncf %87 : vector<32x128xf32> to vector<32x128xbf16>
    %c0_47 = arith.constant 0 : index
    %c0_48 = arith.constant 0 : index
    %89 = vector.load %arg14[%c0_47, %c0_48] : memref<128x256xbf16, #tpu.memory_space<vmem>>, vector<128x256xbf16>
    %cst_49 = arith.constant dense<0.000000e+00> : vector<32x256xf32>
    %90 = tpu.matmul %88, %89, %cst_49 {dimension_numbers = #tpu.dot_dimension_numbers<[1], [0], [0], [1], [0, 0, 1, 1], [], []>} : vector<32x128xbf16>, vector<128x256xbf16>, vector<32x256xf32> -> vector<32x256xf32>
    %c0_50 = arith.constant 0 : index
    %c0_51 = arith.constant 0 : index
    %91 = vector.load %arg15[%c0_50, %c0_51] : memref<1x256xf32, #tpu.memory_space<vmem>>, vector<1x256xf32>
    %92 = vector.broadcast %91 : vector<1x256xf32> to vector<32x256xf32>
    %93 = arith.addf %90, %92 : vector<32x256xf32>
    %cst_52 = arith.constant 0.000000e+00 : f32
    %94 = vector.broadcast %cst_52 : f32 to vector<32x256xf32>
    %95 = arith.maximumf %93, %94 : vector<32x256xf32>
    %96 = arith.truncf %95 : vector<32x256xf32> to vector<32x256xbf16>
    %c0_53 = arith.constant 0 : index
    %c0_54 = arith.constant 0 : index
    %97 = vector.load %arg16[%c0_53, %c0_54] : memref<256x128xbf16, #tpu.memory_space<vmem>>, vector<256x128xbf16>
    %cst_55 = arith.constant dense<0.000000e+00> : vector<32x128xf32>
    %98 = tpu.matmul %96, %97, %cst_55 {dimension_numbers = #tpu.dot_dimension_numbers<[1], [0], [0], [1], [0, 0, 1, 1], [], []>} : vector<32x256xbf16>, vector<256x128xbf16>, vector<32x128xf32> -> vector<32x128xf32>
    %c0_56 = arith.constant 0 : index
    %c0_57 = arith.constant 0 : index
    %99 = vector.load %arg17[%c0_56, %c0_57] : memref<1x128xf32, #tpu.memory_space<vmem>>, vector<1x128xf32>
    %100 = vector.broadcast %99 : vector<1x128xf32> to vector<32x128xf32>
    %101 = arith.addf %98, %100 : vector<32x128xf32>
    %102 = arith.addf %87, %101 : vector<32x128xf32>
    %c0_58 = arith.constant 0 : index
    %c0_59 = arith.constant 0 : index
    %103 = vector.load %arg20[%c0_58, %c0_59] : memref<1x128xf32, #tpu.memory_space<vmem>>, vector<1x128xf32>
    %c0_60 = arith.constant 0 : index
    %c0_61 = arith.constant 0 : index
    %104 = vector.load %arg21[%c0_60, %c0_61] : memref<1x128xf32, #tpu.memory_space<vmem>>, vector<1x128xf32>
    %cst_62 = arith.constant dense<0.000000e+00> : vector<32xf32>
    %105 = vector.multi_reduction <add>, %102, %cst_62 [1] : vector<32x128xf32> to vector<32xf32>
    %106 = vector.shape_cast %105 : vector<32xf32> to vector<32x1xf32>
    %cst_63 = arith.constant 1.280000e+02 : f32
    %107 = vector.broadcast %cst_63 : f32 to vector<32x1xf32>
    %108 = arith.divf %106, %107 : vector<32x1xf32>
    %109 = arith.mulf %102, %102 : vector<32x128xf32>
    %cst_64 = arith.constant dense<0.000000e+00> : vector<32xf32>
    %110 = vector.multi_reduction <add>, %109, %cst_64 [1] : vector<32x128xf32> to vector<32xf32>
    %111 = vector.shape_cast %110 : vector<32xf32> to vector<32x1xf32>
    %cst_65 = arith.constant 1.280000e+02 : f32
    %112 = vector.broadcast %cst_65 : f32 to vector<32x1xf32>
    %113 = arith.divf %111, %112 : vector<32x1xf32>
    %114 = arith.mulf %108, %108 : vector<32x1xf32>
    %115 = arith.subf %113, %114 : vector<32x1xf32>
    %cst_66 = arith.constant 0.000000e+00 : f32
    %116 = vector.broadcast %cst_66 : f32 to vector<32x1xf32>
    %117 = arith.maximumf %115, %116 : vector<32x1xf32>
    %cst_67 = arith.constant 9.99999974E-6 : f32
    %118 = vector.broadcast %cst_67 : f32 to vector<32x1xf32>
    %119 = arith.addf %117, %118 : vector<32x1xf32>
    %120 = math.rsqrt %119 : vector<32x1xf32>
    %121 = vector.broadcast %108 : vector<32x1xf32> to vector<32x128xf32>
    %122 = arith.subf %102, %121 : vector<32x128xf32>
    %123 = vector.broadcast %120 : vector<32x1xf32> to vector<32x128xf32>
    %124 = arith.mulf %122, %123 : vector<32x128xf32>
    %125 = vector.broadcast %103 : vector<1x128xf32> to vector<32x128xf32>
    %126 = arith.mulf %124, %125 : vector<32x128xf32>
    %127 = vector.broadcast %104 : vector<1x128xf32> to vector<32x128xf32>
    %128 = arith.addf %126, %127 : vector<32x128xf32>
    %c0_68 = arith.constant 0 : index
    %c0_69 = arith.constant 0 : index
    %c0_70 = arith.constant 0 : index
    %129 = vector.load %arg22[%c0_68, %c0_69, %c0_70] : memref<1x32x128xf32, #tpu.memory_space<vmem>>, vector<1x32x128xf32>
    %130 = vector.shape_cast %129 : vector<1x32x128xf32> to vector<32x128xf32>
    %131 = vector.shape_cast %128 : vector<32x128xf32> to vector<1x32x128xf32>
    tpu.vector_store %arg22[%c0_68, %c0_69, %c0_70], %131 {strides = array<i32>} : memref<1x32x128xf32, #tpu.memory_space<vmem>>, vector<1x32x128xf32>,
    return
  }
  func.func @transform_0(%arg0: i32, %arg1: i32) -> (i32, i32, i32) {
    %c0_i32 = arith.constant 0 : i32
    %c0_i32_0 = arith.constant 0 : i32
    return %arg1, %arg0, %c0_i32 : i32, i32, i32
  }
  func.func @transform_1(%arg0: i32, %arg1: i32) -> (i32, i32) {
    %c0_i32 = arith.constant 0 : i32
    %c0_i32_0 = arith.constant 0 : i32
    return %arg0, %c0_i32 : i32, i32
  }
  func.func @transform_2(%arg0: i32, %arg1: i32) -> (i32, i32, i32) {
    %c0_i32 = arith.constant 0 : i32
    %c0_i32_0 = arith.constant 0 : i32
    return %arg1, %arg0, %c0_i32 : i32, i32, i32
  }
  func.func @transform_3(%arg0: i32, %arg1: i32) -> (i32, i32) {
    %c0_i32 = arith.constant 0 : i32
    %c0_i32_0 = arith.constant 0 : i32
    return %arg0, %c0_i32 : i32, i32
  }
  func.func @transform_4(%arg0: i32, %arg1: i32) -> (i32, i32, i32) {
    %c0_i32 = arith.constant 0 : i32
    %c0_i32_0 = arith.constant 0 : i32
    %c0_i32_1 = arith.constant 0 : i32
    return %arg1, %c0_i32, %c0_i32_0 : i32, i32, i32
  }
  func.func @transform_5(%arg0: i32, %arg1: i32) -> (i32, i32, i32) {
    %c0_i32 = arith.constant 0 : i32
    %c0_i32_0 = arith.constant 0 : i32
    %c0_i32_1 = arith.constant 0 : i32
    return %arg1, %c0_i32, %c0_i32_0 : i32, i32, i32
  }
  func.func @transform_6(%arg0: i32, %arg1: i32) -> (i32, i32) {
    %c0_i32 = arith.constant 0 : i32
    %c0_i32_0 = arith.constant 0 : i32
    %c0_i32_1 = arith.constant 0 : i32
    return %c0_i32, %c0_i32_0 : i32, i32
  }
  func.func @transform_7(%arg0: i32, %arg1: i32) -> (i32, i32) {
    %c0_i32 = arith.constant 0 : i32
    %c0_i32_0 = arith.constant 0 : i32
    %c0_i32_1 = arith.constant 0 : i32
    return %c0_i32, %c0_i32_0 : i32, i32
  }
  func.func @transform_8(%arg0: i32, %arg1: i32) -> (i32, i32) {
    %c0_i32 = arith.constant 0 : i32
    %c0_i32_0 = arith.constant 0 : i32
    %c0_i32_1 = arith.constant 0 : i32
    return %c0_i32, %c0_i32_0 : i32, i32
  }
  func.func @transform_9(%arg0: i32, %arg1: i32) -> (i32, i32) {
    %c0_i32 = arith.constant 0 : i32
    %c0_i32_0 = arith.constant 0 : i32
    %c0_i32_1 = arith.constant 0 : i32
    return %c0_i32, %c0_i32_0 : i32, i32
  }
  func.func @transform_10(%arg0: i32, %arg1: i32) -> (i32, i32) {
    %c0_i32 = arith.constant 0 : i32
    %c0_i32_0 = arith.constant 0 : i32
    %c0_i32_1 = arith.constant 0 : i32
    return %c0_i32, %c0_i32_0 : i32, i32
  }
  func.func @transform_11(%arg0: i32, %arg1: i32) -> (i32, i32) {
    %c0_i32 = arith.constant 0 : i32
    %c0_i32_0 = arith.constant 0 : i32
    %c0_i32_1 = arith.constant 0 : i32
    return %c0_i32, %c0_i32_0 : i32, i32
  }
  func.func @transform_12(%arg0: i32, %arg1: i32) -> (i32, i32) {
    %c0_i32 = arith.constant 0 : i32
    %c0_i32_0 = arith.constant 0 : i32
    %c0_i32_1 = arith.constant 0 : i32
    return %c0_i32, %c0_i32_0 : i32, i32
  }
  func.func @transform_13(%arg0: i32, %arg1: i32) -> (i32, i32) {
    %c0_i32 = arith.constant 0 : i32
    %c0_i32_0 = arith.constant 0 : i32
    %c0_i32_1 = arith.constant 0 : i32
    return %c0_i32, %c0_i32_0 : i32, i32
  }
  func.func @transform_14(%arg0: i32, %arg1: i32) -> (i32, i32) {
    %c0_i32 = arith.constant 0 : i32
    %c0_i32_0 = arith.constant 0 : i32
    %c0_i32_1 = arith.constant 0 : i32
    return %c0_i32, %c0_i32_0 : i32, i32
  }
  func.func @transform_15(%arg0: i32, %arg1: i32) -> (i32, i32) {
    %c0_i32 = arith.constant 0 : i32
    %c0_i32_0 = arith.constant 0 : i32
    %c0_i32_1 = arith.constant 0 : i32
    return %c0_i32, %c0_i32_0 : i32, i32
  }
  func.func @transform_16(%arg0: i32, %arg1: i32) -> (i32, i32) {
    %c0_i32 = arith.constant 0 : i32
    %c0_i32_0 = arith.constant 0 : i32
    %c0_i32_1 = arith.constant 0 : i32
    return %c0_i32, %c0_i32_0 : i32, i32
  }
  func.func @transform_17(%arg0: i32, %arg1: i32) -> (i32, i32) {
    %c0_i32 = arith.constant 0 : i32
    %c0_i32_0 = arith.constant 0 : i32
    %c0_i32_1 = arith.constant 0 : i32
    return %c0_i32, %c0_i32_0 : i32, i32
  }
  func.func @transform_18(%arg0: i32, %arg1: i32) -> (i32, i32) {
    %c0_i32 = arith.constant 0 : i32
    %c0_i32_0 = arith.constant 0 : i32
    %c0_i32_1 = arith.constant 0 : i32
    return %c0_i32, %c0_i32_0 : i32, i32
  }
  func.func @transform_19(%arg0: i32, %arg1: i32) -> (i32, i32) {
    %c0_i32 = arith.constant 0 : i32
    %c0_i32_0 = arith.constant 0 : i32
    %c0_i32_1 = arith.constant 0 : i32
    return %c0_i32, %c0_i32_0 : i32, i32
  }
  func.func @transform_20(%arg0: i32, %arg1: i32) -> (i32, i32, i32) {
    %c0_i32 = arith.constant 0 : i32
    %c0_i32_0 = arith.constant 0 : i32
    return %arg1, %arg0, %c0_i32 : i32, i32, i32
  }
}

</mosaic_0001>

<bundles_post_ra>
// kernel: gated_merge_pallas.1
= control target key start
LH: loop header
LB: loop body
LE: loop exit
PB: predicated region body
PF: predicated region fallthrough
CT: control target
= control target key end

     0   :  { %s2343_s22 = smov 0   ;;  %s2345_s23 = smov 0   ;;  %s2681_s0 = inlined_call_operand.vmem [shape: f32[4,32,128], index: 0, kind: input, shape index: {}]   ;;  %s2682_s1 = inlined_call_operand.vmem [shape: f32[32,128], index: 1, kind: input, shape index: {}]   ;;  %s2683_s2 = inlined_call_operand.vmem [shape: f32[4,32,128], index: 2, kind: input, shape index: {}]   ;;  %s2684_s3 = inlined_call_operand.vmem [shape: f32[32,8], index: 3, kind: input, shape index: {}]   ;;  %s2685_s4 = inlined_call_operand.vmem [shape: bf16[4,8,128], index: 4, kind: input, shape index: {}]   ;;  %s2686_s5 = inlined_call_operand.vmem [shape: f32[4,1,128], index: 5, kind: input, shape index: {}]   ;;  %s2687_s6 = inlined_call_operand.vmem [shape: bf16[128,128], index: 6, kind: input, shape index: {}]   ;;  %s2688_s7 = inlined_call_operand.vmem [shape: f32[1,128], index: 7, kind: input, shape index: {}]   ;;  %s2689_s8 = inlined_call_operand.vmem [shape: f32[1,128], index: 8, kind: input, shape index: {}]   ;;  %s2690_s9 = inlined_call_operand.vmem [shape: f32[1,128], index: 9, kind: input, shape index: {}]   ;;  %s2691_s10 = inlined_call_operand.vmem [shape: bf16[128,128], index: 10, kind: input, shape index: {}]   ;;  %s2692_s11 = inlined_call_operand.vmem [shape: f32[1,128], index: 11, kind: input, shape index: {}]   ;;  %s2693_s12 = inlined_call_operand.vmem [shape: bf16[128,256], index: 12, kind: input, shape index: {}]   ;;  %s2694_s13 = inlined_call_operand.vmem [shape: f32[1,256], index: 13, kind: input, shape index: {}]   ;;  %s2695_s14 = inlined_call_operand.vmem [shape: bf16[256,128], index: 14, kind: input, shape index: {}]   ;;  %s2696_s15 = inlined_call_operand.vmem [shape: f32[1,128], index: 15, kind: input, shape index: {}]   ;;  %s2697_s16 = inlined_call_operand.vmem [shape: f32[1,128], index: 16, kind: input, shape index: {}]   ;;  %s2698_s17 = inlined_call_operand.vmem [shape: f32[1,128], index: 17, kind: input, shape index: {}]   ;;  %s2699_s18 = inlined_call_operand.vmem [shape: f32[1,128], index: 18, kind: input, shape index: {}]   ;;  %s2700_s19 = inlined_call_operand.vmem [shape: f32[1,128], index: 19, kind: input, shape index: {}]   ;;  %s2701_s20 = inlined_call_operand.vmem [shape: f32[4,32,128], index: 20, kind: output, shape index: {}]  }
   0x1   :  { %2705 = sst [smem:[#allocation4_spill]] %s2681_s0 }
   0x2   :  { %2706 = sst [smem:[#allocation5_spill]] %s2682_s1  ;;  %s2341_s1 = smov 0  }
   0x3   :  { %2707 = sst [smem:[#allocation6_spill]] %s2683_s2 }
   0x4   :  { %2708 = sst [smem:[#allocation7_spill]] %s2684_s3 }
   0x5   :  { %2709 = sst [smem:[#allocation8_spill]] %s2685_s4 }
   0x6   :  { %2710 = sst [smem:[#allocation9_spill]] %s2687_s6 }
   0x7 LB: > { %2711 = sst [smem:[#allocation2_spill]] %s2229_s22  ;;  %s39_s24 = sadd.s32 1, %s2229_s22  ;;  %s2233_s23 = sphi %s2345_s23, %s30_s23   ;;  %s2229_s22 = sphi %s2343_s22, %s2720_s22   ;;  %s2225_s1 = sphi %s2341_s1, %s2719_s1  }
   0x8   : > { %p1915_p0 = scmp.ge.s32.totalorder %s2233_s23, 1  ;;  %p40_p1 = scmp.ge.s32.totalorder %s39_s24, 4 }
   0x9   : > { %p639_p2 = scmp.lt.s32.totalorder %s2233_s23, 5 }
   0xa   : > { %s2722_s24 = smov (%p40_p1, %s39_s24), 0 }
   0xb   : > { %2712 = sst [smem:[#allocation3_spill]] %s2722_s24  ;;  %p640_p3 = pnand %p1915_p0, %p639_p2 }
   0xc   : > { %s2713_s6 = sld [smem:[#allocation9_spill]] (!%p640_p3)  ;;  %p732_p4 = scmp.lt.s32.totalorder (!%p640_p3), %s2225_s1, 3  ;;  %v1923_v22 = vld [vmem:[%s2688_s7] ss:$0 sm:$0xff] (!%p640_p3)  ;;  %vm1145_vm0 = vcmask (!%p640_p3), 1043456   ;;  %vm1138_vm1 = vcmask (!%p640_p3), 64512  }
   0xd   : > { %643 = sbr.rel (%p640_p3) target bundleno = 1466 (0x5ba), region = 100  ;;  %s2714_s0 = sld [smem:[#allocation6_spill]] (!%p640_p3)  ;;  %v2123_v36 = vld [vmem:[%s2691_s10] sm:$0xff] (!%p640_p3)   ;;  %v2124_v44 = vld [vmem:[%s2691_s10 + $0x8] sm:$0xff] (!%p640_p3)   ;;  %v2125_v45 = vld [vmem:[%s2691_s10 + $0x10] sm:$0xff] (!%p640_p3)  }
   0xe   : > { %s2715_s24 = sld [smem:[#allocation5_spill]] (!%p640_p3)  ;;  %s2716_s25 = sld [smem:[#allocation8_spill]] (!%p640_p3)  ;;  %2063 = vmatprep.subr.bf16.mxu1 (!%p640_p3), %v2123_v36  ;;  %v2126_v46 = vld [vmem:[%s2691_s10 + $0x18] sm:$0xff] (!%p640_p3)   ;;  %v2127_v47 = vld [vmem:[%s2691_s10 + $0x20] sm:$0xff] (!%p640_p3)   ;;  %v2128_v48 = vld [vmem:[%s2691_s10 + $0x28] sm:$0xff] (!%p640_p3)  }
   0xf   : > { %s2717_s30 = sld [smem:[#allocation7_spill]] (!%p640_p3)  ;;  %2064 = vmatpush3.bf16.msra.mxu1 (!%p640_p3), %v2123_v36  ;;  %v2129_v49 = vld [vmem:[%s2691_s10 + $0x30] sm:$0xff] (!%p640_p3)   ;;  %v2130_v50 = vld [vmem:[%s2691_s10 + $0x38] sm:$0xff] (!%p640_p3)  }
  0x10   : > { %2065 = vmatprep.subr.bf16.mxu1 (!%p640_p3), %v2124_v44 }
  0x12   : > { %v2115_v0 = vld [vmem:[%s2713_s6] sm:$0xff] (!%p640_p3)   ;;  %v2116_v1 = vld [vmem:[%s2713_s6 + $0x8] sm:$0xff] (!%p640_p3)   ;;  %v2117_v2 = vld [vmem:[%s2713_s6 + $0x10] sm:$0xff] (!%p640_p3)  }
  0x13   : > { %2043 = vmatprep.subr.bf16.mxu0 (!%p640_p3), %v2115_v0  ;;  %v2118_v3 = vld [vmem:[%s2713_s6 + $0x18] sm:$0xff] (!%p640_p3)   ;;  %v2119_v9 = vld [vmem:[%s2713_s6 + $0x20] sm:$0xff] (!%p640_p3)   ;;  %v2120_v12 = vld [vmem:[%s2713_s6 + $0x28] sm:$0xff] (!%p640_p3)   ;;  %2066 = vmatpush3.bf16.msra.mxu1 (!%p640_p3), %v2124_v44 }
  0x14   : > { %s2724_s1 = smov (!%p732_p4, %s2225_s1), 3  ;;  %2044 = vmatpush3.bf16.msra.mxu0 %v2115_v0  ;;  %v785_v4 = vld [vmem:[%s2715_s24] sm:$0xff]  ;;  %v786_v5 = vld [vmem:[%s2715_s24 + $0x8] sm:$0xff]  ;;  %v2121_v13 = vld [vmem:[%s2713_s6 + $0x30] sm:$0xff]   ;;  %2067 = vmatprep.subr.bf16.mxu1 %v2125_v45 }
  0x15   : > { %2045 = vmatprep.subr.bf16.mxu0 %v2116_v1  ;;  %s2371_s4 = sshll.u32 %s2724_s1, 5  ;;  %v787_v14 = vld [vmem:[%s2715_s24 + $0x10] sm:$0xff]  ;;  %v788_v15 = vld [vmem:[%s2715_s24 + $0x18] sm:$0xff]  ;;  %v1124_v38 = vld [vmem:[%s2717_s30] sm:$0xff]  ;;  %s769_s2 = scalar_lea.vmem %s2686_s5, %s2724_s1 }
  0x16   : > { %s755_s21 = scalar_lea.vmem %s2714_s0, %s2371_s4  ;;  %v2122_v18 = vld [vmem:[%s2713_s6 + $0x38] sm:$0xff]   ;;  %v1125_v39 = vld [vmem:[%s2717_s30 + $0x8] sm:$0xff]  ;;  %v1126_v41 = vld [vmem:[%s2717_s30 + $0x10] sm:$0xff]  ;;  %s2718_s6 = sld [smem:[#allocation4_spill]] }
  0x17   : > { %v789_v6 = vld [vmem:[%s755_s21] sm:$0xff]  ;;  %v790_v7 = vld [vmem:[%s755_s21 + $0x8] sm:$0xff]  ;;  %v791_v16 = vld [vmem:[%s755_s21 + $0x10] sm:$0xff]  ;;  %v1128_v40 = vpack.c.bf16 %v1125_v39, %v1124_v38  ;;  %2068 = vmatpush3.bf16.msra.mxu1 %v2125_v45 }
  0x18   : > { %2046 = vmatpush3.bf16.msra.mxu0 %v2116_v1  ;;  %v793_v8 = vadd.f32 %v789_v6, %v785_v4  ;;  %v794_v10 = vadd.f32 %v790_v7, %v786_v5  ;;  %v792_v17 = vld [vmem:[%s755_s21 + $0x18] sm:$0xff]  ;;  %v795_v19 = vadd.f32 %v791_v16, %v787_v14  ;;  %s1920_s21 = sshll.u32 %s2724_s1, 2  ;;  %2069 = vmatprep.subr.bf16.mxu1 %v2126_v46  ;;  %s778_s1 = scalar_lea.vmem %s2701_s20, %s2371_s4 }
  0x19   : > { %2047 = vmatprep.subr.bf16.mxu0 %v2117_v2  ;;  %v796_v20 = vadd.f32 %v792_v17, %v788_v15  ;;  %s766_s3 = scalar_lea.vmem %s2716_s25, %s1920_s21  ;;  %v1127_v42 = vld [vmem:[%s2717_s30 + $0x18] sm:$0xff] }
  0x1a   : > { %v797_v11 = vpack.c.bf16 %v794_v10, %v793_v8  ;;  %v1130_v35 = vld [vmem:[%s766_s3] sm:$0xf]  ;;  %v1129_v43 = vpack.c.bf16 %v1127_v42, %v1126_v41 }
  0x1b   : > { %v798_v21 = vpack.c.bf16 %v796_v20, %v795_v19  ;;  %v1147_v37 = vsel %vm1145_vm0, %v1130_v35, 0  ;;  %2070 = vmatpush3.bf16.msra.mxu1 %v2126_v46 }
  0x1c   : > { %2048 = vmatpush3.bf16.msra.mxu0 %v2117_v2  ;;  %2059 = vmatprep.mubr.bf16.mxu0 %v797_v11  ;;  %s739_s27 = scalar_lea.vmem %s2718_s6, %s2371_s4 }
  0x1d   : > { %2049 = vmatprep.subr.bf16.mxu0 %v2118_v3  ;;  %2071 = vmatprep.subr.bf16.mxu1 %v2127_v47 }
  0x1f   : > { %2072 = vmatpush3.bf16.msra.mxu1 %v2127_v47 }
  0x20   : > { %2050 = vmatpush3.bf16.msra.mxu0 %v2118_v3  ;;  %2073 = vmatprep.subr.bf16.mxu1 %v2128_v48 }
  0x21   : > { %2051 = vmatprep.subr.bf16.mxu0 %v2119_v9 }
  0x23   : > { %2074 = vmatpush3.bf16.msra.mxu1 %v2128_v48 }
  0x24   : > { %2052 = vmatpush3.bf16.msra.mxu0 %v2119_v9  ;;  %2075 = vmatprep.subr.bf16.mxu1 %v2129_v49 }
  0x25   : > { %2053 = vmatprep.subr.bf16.mxu0 %v2120_v12 }
  0x27   : > { %2076 = vmatpush3.bf16.msra.mxu1 %v2129_v49 }
  0x28   : > { %2054 = vmatpush3.bf16.msra.mxu0 %v2120_v12  ;;  %2077 = vmatprep.subr.bf16.mxu1 %v2130_v50 }
  0x29   : > { %2055 = vmatprep.subr.bf16.mxu0 %v2121_v13 }
  0x2b   : > { %2078 = vmatpush3.bf16.msra.mxu1 %v2130_v50 }
  0x2c   : > { %2056 = vmatpush3.bf16.msra.mxu0 %v2121_v13 }
  0x2d   : > { %2057 = vmatprep.subr.bf16.mxu0 %v2122_v18 }
  0x30   : > { %2058 = vmatpush3.bf16.msra.mxu0 %v2122_v18 }
  0x31   : > { %2089 = vmatprep.subr.msk.bf16.mxu0 %vm1145_vm0, %v1130_v35 }
  0x33   : > { %2060 = vmatmul.mubr.bf16.vlgmr.msra.gmra.mrb[0].mxu0 %v798_v21 }
  0x34   : > { %2084 = vmatpush3.bf16.msra.mxu0 %v1147_v37  ;;  %2085 = vmatprep.mubr.msk.bf16.mxu0 %vm1138_vm1, %v1128_v40 }
  0x3b   : > { %2086 = vmatmul.mubr.msk.bf16.vlgmr.msra.gmra.mrb[4].mxu0 %vm1138_vm1, %v1129_v43 }
 0x106   : > { %v2061_v23 = vpop.f32.mrb[0].mxu0 }
 0x107   : > { %v2407_v24 = vadd.f32 %v2061_v23, %v1923_v22  ;;  %v904_v25 = vpop.f32.mrb[1].mxu0 }
 0x108   : > { %v2409_v26 = vadd.f32 %v1923_v22, %v904_v25  ;;  %v2062_v27 = vpop.f32.mrb[2].mxu0 }
 0x109   : > { %925 = vadd.xlane.f32.xlu1 %v2407_v24  ;;  %v907_v28 = vpop.f32.mrb[3].mxu0  ;;  %v2413_v29 = vadd.f32 %v2062_v27, %v1923_v22  ;;  %v936_v34 = vmul.f32 %v2407_v24, %v2407_v24  ;;  %v1933_v27 = vld [vmem:[%s2690_s9] ss:$0 sm:$0xff] }
 0x10a   : > { %921 = vadd.xlane.f32.xlu0 %v2409_v26  ;;  %v2415_v30 = vadd.f32 %v1923_v22, %v907_v28  ;;  %v934_v32 = vmul.f32 %v2409_v26, %v2409_v26  ;;  %v1932_v22 = vld [vmem:[%s2689_s8] ss:$0 sm:$0xff] }
 0x10b   : > { %v937_v33 = vmul.f32 %v2413_v29, %v2413_v29 }
 0x10c   : > { %v935_v31 = vmul.f32 %v2415_v30, %v2415_v30 }
 0x10d   : > { %927 = vadd.xlane.f32.xlu1 %v2413_v29 }
 0x10e   : > { %923 = vadd.xlane.f32.xlu0 %v2415_v30 }
 0x111   : > { %940 = vadd.xlane.f32.xlu1 %v935_v31 }
 0x112   : > { %938 = vadd.xlane.f32.xlu0 %v934_v32 }
 0x115   : > { %944 = vadd.xlane.f32.xlu1 %v937_v33 }
 0x116   : > { %942 = vadd.xlane.f32.xlu0 %v936_v34 }
 0x196   : > { %v926_v51 = vpop.xlane.xlu1 %925 }
 0x197   : > { %v922_v52 = vpop.xlane.xlu0 %921  ;;  %v932_v62 = vmul.f32 0.0078125, %v926_v51  ;;  %v1943_v51 = vld [vmem:[%s769_s2] ss:$0 sm:$0xff] }
 0x198   : > { %v930_v55 = vmul.f32 0.0078125, %v922_v52 }
 0x199   : > { %v952_v8 = vmul.f32 %v932_v62, %v932_v62 }
 0x19a   : > { %v928_v53 = vpop.xlane.xlu1 %927  ;;  %v950_v63 = vmul.f32 %v930_v55, %v930_v55  ;;  %v970_v21 = vsub.f32 %v2409_v26, %v930_v55 }
 0x19b   : > { %v924_v54 = vpop.xlane.xlu0 %923  ;;  %v933_v59 = vmul.f32 0.0078125, %v928_v53 }
 0x19c   : > { %v931_v56 = vmul.f32 0.0078125, %v924_v54 }
 0x19d   : > { %v953_v4 = vmul.f32 %v933_v59, %v933_v59  ;;  %v973_v31 = vsub.f32 %v2413_v29, %v933_v59 }
 0x19e   : > { %v951_v57 = vmul.f32 %v931_v56, %v931_v56  ;;  %v941_v58 = vpop.xlane.xlu1 %940  ;;  %v971_v19 = vsub.f32 %v2415_v30, %v931_v56  ;;  %v972_v30 = vsub.f32 %v2407_v24, %v932_v62  ;;  %v2087_v24 = vpop.f32.mrb[4].mxu0 }
 0x19f   : > { %v947_v60 = vmul.f32 0.0078125, %v941_v58  ;;  %v939_v61 = vpop.xlane.xlu0 %938  ;;  %v1183_v48 = vpop.f32.mrb[5].mxu0  ;;  %v1192_v52 = vadd.f32 %v2087_v24, %v1943_v51  ;;  %v2154_v24 = vld [vmem:[%s2693_s12 + $0x74] ss:$8 sps:$4 sm:$0xff]  }
 0x1a0   : > { %v946_v0 = vmul.f32 0.0078125, %v939_v61  ;;  %v2088_v49 = vpop.f32.mrb[6].mxu0  ;;  %v1184_v53 = vadd.f32 %v1943_v51, %v1183_v48  ;;  %v2235_v48 = vmov 0  }
 0x1a1   : > { %v955_v1 = vsub.f32 %v947_v60, %v951_v57  ;;  %v1186_v50 = vpop.f32.mrb[7].mxu0  ;;  %v1948_v54 = vmul.f32 -1.442695, %v1192_v52  ;;  %v1195_v55 = vadd.f32 %v2088_v49, %v1943_v51  ;;  %v2152_v49 = vld [vmem:[%s2693_s12 + $0x70] ss:$8 sps:$4 sm:$0xff]   ;;  %v2157_v52 = vld [vmem:[%s2695_s14 + $0x48] sm:$0xff]  }
 0x1a2   : > { %v954_v2 = vsub.f32 %v946_v0, %v950_v63  ;;  %v945_v3 = vpop.xlane.xlu1 %944  ;;  %v1946_v56 = vmul.f32 -1.442695, %v1184_v53  ;;  %v1187_v57 = vadd.f32 %v1943_v51, %v1186_v50  ;;  %v2155_v50 = vld [vmem:[%s2695_s14 + $0x40] sm:$0xff]   ;;  %v2158_v53 = vld [vmem:[%s2695_s14 + $0x8] sm:$0xff]  }
 0x1a3   : > { %v959_v5 = vmax.f32 %v955_v1, 0.0  ;;  %v949_v6 = vmul.f32 0.0078125, %v945_v3  ;;  %v943_v7 = vpop.xlane.xlu0 %942  ;;  %v1949_v58 = vmul.f32 -1.442695, %v1195_v55  ;;  %v2156_v51 = vld [vmem:[%s2695_s14] sm:$0xff]   ;;  %2015 = vmatprep.subr.bf16.mxu0 %v2155_v50  ;;  %v2160_v55 = vld [vmem:[%s2695_s14 + $0x10] sm:$0xff]  }
 0x1a4   : > { %v958_v9 = vmax.f32 %v954_v2, 0.0  ;;  %v948_v10 = vmul.f32 0.0078125, %v943_v7  ;;  %v1947_v59 = vmul.f32 -1.442695, %v1187_v57  ;;  %2016 = vmatpush3.bf16.msra.mxu0 %v2156_v51  ;;  %v2162_v57 = vld [vmem:[%s2695_s14 + $0x18] sm:$0xff]  }
 0x1a5   : > { %v963_v11 = vadd.f32 1e-05, %v959_v5  ;;  %v957_v12 = vsub.f32 %v949_v6, %v953_v4  ;;  %v1934_v4 = vld [vmem:[%s2692_s11] ss:$0 sm:$0xff]  ;;  %2017 = vmatprep.subr.bf16.mxu0 %v2157_v52 }
 0x1a6   : > { %v962_v13 = vadd.f32 1e-05, %v958_v9  ;;  %v956_v14 = vsub.f32 %v948_v10, %v952_v8 }
 0x1a7   : > { %2171 = vrsqrt.f32 %v963_v11  ;;  %v961_v15 = vmax.f32 %v957_v12, 0.0 }
 0x1a8   : > { %2173 = vrsqrt.f32 %v962_v13  ;;  %v960_v16 = vmax.f32 %v956_v14, 0.0  ;;  %2018 = vmatpush3.bf16.msra.mxu0 %v2158_v53 }
 0x1a9   : > { %v965_v17 = vadd.f32 1e-05, %v961_v15  ;;  %v781_v15 = vld [vmem:[%s739_s27] sm:$0xff] }
 0x1aa   : > { %v964_v18 = vadd.f32 1e-05, %v960_v16 }
 0x1ab   : > { %2175 = vrsqrt.f32 %v965_v17 }
 0x1ac   : > { %2177 = vrsqrt.f32 %v964_v18 }
 0x1ad   : > { %2179 = vpow2.f32 %v1948_v54  ;;  %v2159_v54 = vld [vmem:[%s2695_s14 + $0x50] sm:$0xff]  }
 0x1ae   : > { %2181 = vpow2.f32 %v1946_v56  ;;  %2019 = vmatprep.subr.bf16.mxu0 %v2159_v54  ;;  %v2161_v56 = vld [vmem:[%s2695_s14 + $0x58] sm:$0xff]  }
 0x1af   : > { %2183 = vpow2.f32 %v1949_v58  ;;  %2020 = vmatpush3.bf16.msra.mxu0 %v2160_v55  ;;  %v2163_v58 = vld [vmem:[%s2695_s14 + $0x60] sm:$0xff]   ;;  %v2167_v55 = vld [vmem:[%s2695_s14 + $0x70] sm:$0xff]  }
 0x1b0   : > { %2185 = vpow2.f32 %v1947_v59  ;;  %2021 = vmatprep.subr.bf16.mxu0 %v2161_v56  ;;  %v2164_v59 = vld [vmem:[%s2695_s14 + $0x20] sm:$0xff]   ;;  %v2169_v56 = vld [vmem:[%s2695_s14 + $0x78] sm:$0xff]  }
 0x1b1   : > { %v2172_v20 = vpop.eup %2171 }
 0x1b2   : > { %v2174_v23 = vpop.eup %2173  ;;  %v975_v25 = vmul.f32 %v2172_v20, %v971_v19 }
 0x1b3   : > { %v974_v28 = vmul.f32 %v2174_v23, %v970_v21  ;;  %v782_v21 = vld [vmem:[%s739_s27 + $0x8] sm:$0xff]  ;;  %2022 = vmatpush3.bf16.msra.mxu0 %v2162_v57  ;;  %v2170_v57 = vld [vmem:[%s2695_s14 + $0x38] sm:$0xff]  }
 0x1b4   : > { %v985_v32 = vmul.f32 %v1932_v22, %v975_v25  ;;  %2023 = vmatprep.subr.bf16.mxu0 %v2163_v58  ;;  %v1328_v58 = vlaneseq }
 0x1b5   : > { %v2176_v33 = vpop.eup %2175  ;;  %v984_v34 = vmul.f32 %v1932_v22, %v974_v28  ;;  %v783_v28 = vld [vmem:[%s739_s27 + $0x10] sm:$0xff] }
 0x1b6   : > { %v2178_v35 = vpop.eup %2177  ;;  %v995_v26 = vadd.f32 %v1933_v27, %v985_v32  ;;  %v977_v36 = vmul.f32 %v2176_v33, %v973_v31  ;;  %v784_v32 = vld [vmem:[%s739_s27 + $0x18] sm:$0xff] }
 0x1b7   : > { %v994_v37 = vadd.f32 %v1933_v27, %v984_v34  ;;  %v976_v38 = vmul.f32 %v2178_v35, %v972_v30  ;;  %v2180_v60 = vpop.eup %2179  ;;  %2024 = vmatpush3.bf16.msra.mxu0 %v2164_v59  ;;  %v1329_v59 = vshrl.u32 %v1328_v58, 7 }
 0x1b8   : > { %v999_v39 = vmax.f32 %v995_v26, 0.0  ;;  %v987_v40 = vmul.f32 %v1932_v22, %v977_v36  ;;  %v2182_v61 = vpop.eup %2181  ;;  %v1212_v62 = vadd.f32 1.0, %v2180_v60  ;;  %v2133_v26 = vld [vmem:[%s2693_s12 + $0x4] ss:$8 sps:$4 sm:$0xff]   ;;  %v2131_v36 = vld [vmem:[%s2693_s12] ss:$8 sps:$4 sm:$0xff]  }
 0x1b9   : > { %v998_v41 = vmax.f32 %v994_v37, 0.0  ;;  %v986_v42 = vmul.f32 %v1932_v22, %v976_v38  ;;  %v2184_v63 = vpop.eup %2183  ;;  %v1210_v0 = vadd.f32 1.0, %v2182_v61  ;;  %1418 = vmatprep.subr.bf16.mxu1 %v2133_v26  ;;  %v2136_v37 = vld [vmem:[%s2693_s12 + $0x14] ss:$8 sps:$4 sm:$0xff]   ;;  %v2134_v38 = vld [vmem:[%s2693_s12 + $0x10] ss:$8 sps:$4 sm:$0xff]  }
 0x1ba   : > { %v997_v43 = vadd.f32 %v1933_v27, %v987_v40  ;;  %v2186_v1 = vpop.eup %2185  ;;  %2187 = vrcp.f32 %v1212_v62  ;;  %v1213_v2 = vadd.f32 1.0, %v2184_v63  ;;  %v2137_v40 = vld [vmem:[%s2693_s12 + $0x20] ss:$8 sps:$4 sm:$0xff]  }
 0x1bb   : > { %v1002_v44 = vpack.c.bf16 %v999_v39, %v998_v41  ;;  %v996_v45 = vadd.f32 %v1933_v27, %v986_v42  ;;  %2189 = vrcp.f32 %v1210_v0  ;;  %v1211_v3 = vadd.f32 1.0, %v2186_v1  ;;  %v2139_v39 = vld [vmem:[%s2693_s12 + $0x24] ss:$8 sps:$4 sm:$0xff]   ;;  %v2142_v41 = vld [vmem:[%s2693_s12 + $0x34] ss:$8 sps:$4 sm:$0xff]  }
 0x1bc   : > { %v1001_v46 = vmax.f32 %v997_v43, 0.0  ;;  %2191 = vrcp.f32 %v1213_v2  ;;  %v2140_v42 = vld [vmem:[%s2693_s12 + $0x30] ss:$8 sps:$4 sm:$0xff]   ;;  %v2145_v43 = vld [vmem:[%s2693_s12 + $0x44] ss:$8 sps:$4 sm:$0xff]  }
 0x1bd   : > { %2079 = vmatprep.mubr.bf16.mxu1 %v1002_v44  ;;  %v1000_v29 = vmax.f32 %v996_v45, 0.0  ;;  %2193 = vrcp.f32 %v1211_v3  ;;  %v2143_v44 = vld [vmem:[%s2693_s12 + $0x40] ss:$8 sps:$4 sm:$0xff]   ;;  %v2148_v45 = vld [vmem:[%s2693_s12 + $0x54] ss:$8 sps:$4 sm:$0xff]  }
 0x1be   : > { %v2165_v60 = vld [vmem:[%s2695_s14 + $0x68] sm:$0xff]  }
 0x1bf   : > { %v1003_v47 = vpack.c.bf16 %v1001_v46, %v1000_v29  ;;  %v2146_v46 = vld [vmem:[%s2693_s12 + $0x50] ss:$8 sps:$4 sm:$0xff]   ;;  %v2151_v29 = vld [vmem:[%s2693_s12 + $0x64] ss:$8 sps:$4 sm:$0xff]   ;;  %2025 = vmatprep.subr.bf16.mxu0 %v2165_v60  ;;  %v1330_v60 = vsub.s32 0, %v1329_v59 }
 0x1c1   : > { %2080 = vmatmul.mubr.bf16.vlgmr.msra.gmra.mrb[0].mxu1 %v1003_v47  ;;  %v2149_v47 = vld [vmem:[%s2693_s12 + $0x60] ss:$8 sps:$4 sm:$0xff]  }
 0x1c2   : > { %1419 = vmatpush1.bf16.msra.mxu1 %v2131_v36  ;;  %1450 = vmatprep.mubr.bf16.mxu1 %v2235_v48 }
 0x1c3   : > { %1420 = vmatprep.subr.bf16.mxu1 %v2136_v37  ;;  %v1950_v37 = vld [vmem:[%s2697_s16] ss:$0 sm:$0xff] }
 0x1c4   : > { %v2188_v5 = vpop.eup %2187 }
 0x1c5   : > { %v2190_v7 = vpop.eup %2189 }
 0x1c6   : > { %v2192_v16 = vpop.eup %2191  ;;  %1421 = vmatpush1.bf16.msra.mxu1 %v2134_v38 }
 0x1c7   : > { %v2194_v19 = vpop.eup %2193  ;;  %1422 = vmatprep.subr.bf16.mxu1 %v2139_v39 }
 0x1ca   : > { %1423 = vmatpush1.bf16.msra.mxu1 %v2137_v40 }
 0x1cb   : > { %1424 = vmatprep.subr.bf16.mxu1 %v2142_v41 }
 0x1ce   : > { %1425 = vmatpush1.bf16.msra.mxu1 %v2140_v42 }
 0x1cf   : > { %1426 = vmatprep.subr.bf16.mxu1 %v2145_v43  ;;  %v1951_v43 = vld [vmem:[%s2698_s17] ss:$0 sm:$0xff] }
 0x1d2   : > { %1427 = vmatpush1.bf16.msra.mxu1 %v2143_v44 }
 0x1d3   : > { %1428 = vmatprep.subr.bf16.mxu1 %v2148_v45 }
 0x1d6   : > { %1429 = vmatpush1.bf16.msra.mxu1 %v2146_v46 }
 0x1d7   : > { %1430 = vmatprep.subr.bf16.mxu1 %v2151_v29 }
 0x1da   : > { %1431 = vmatpush1.bf16.msra.mxu1 %v2149_v47 }
 0x1db   : > { %1432 = vmatprep.subr.bf16.mxu1 %v2154_v24 }
 0x1de   : > { %1433 = vmatpush1.bf16.msra.mxu1 %v2152_v49 }
 0x294   : > { %v2081_v6 = vpop.f32.mrb[0].mxu1 }
 0x295   : > { %v1118_v8 = vadd.f32 %v2081_v6, %v1934_v4  ;;  %v1109_v9 = vpop.f32.mrb[1].mxu1 }
 0x296   : > { %v1110_v10 = vadd.f32 %v1934_v4, %v1109_v9  ;;  %v2082_v11 = vpop.f32.mrb[2].mxu1 }
 0x297   : > { %v1224_v12 = vmul.f32 %v2188_v5, %v1118_v8  ;;  %v1121_v13 = vadd.f32 %v2082_v11, %v1934_v4  ;;  %v1112_v14 = vpop.f32.mrb[3].mxu1 }
 0x298   : > { %v1222_v17 = vmul.f32 %v2190_v7, %v1110_v10  ;;  %v1113_v18 = vadd.f32 %v1934_v4, %v1112_v14 }
 0x299   : > { %v1225_v20 = vmul.f32 %v2192_v16, %v1121_v13  ;;  %v2498_v33 = vadd.f32 %v1224_v12, %v783_v28 }
 0x29a   : > { %v1223_v22 = vmul.f32 %v2194_v19, %v1113_v18  ;;  %v2488_v23 = vadd.f32 %v1222_v17, %v781_v15 }
 0x29b   : > { %v2501_v30 = vadd.f32 %v1225_v20, %v784_v32  ;;  %v1246_v34 = vmul.f32 %v2498_v33, %v2498_v33 }
 0x29c   : > { %1232 = vadd.xlane.f32.xlu0 %v2488_v23  ;;  %v2491_v25 = vadd.f32 %v1223_v22, %v782_v21  ;;  %v1244_v27 = vmul.f32 %v2488_v23, %v2488_v23 }
 0x29d   : > { %v1247_v35 = vmul.f32 %v2501_v30, %v2501_v30 }
 0x29e   : > { %1234 = vadd.xlane.f32.xlu1 %v2491_v25  ;;  %v1245_v31 = vmul.f32 %v2491_v25, %v2491_v25 }
 0x2a0   : > { %1248 = vadd.xlane.f32.xlu0 %v1244_v27 }
 0x2a2   : > { %1250 = vadd.xlane.f32.xlu1 %v1245_v31 }
 0x2a4   : > { %1236 = vadd.xlane.f32.xlu0 %v2498_v33 }
 0x2a6   : > { %1238 = vadd.xlane.f32.xlu1 %v2501_v30 }
 0x2a8   : > { %1252 = vadd.xlane.f32.xlu0 %v1246_v34 }
 0x2aa   : > { %1254 = vadd.xlane.f32.xlu1 %v1247_v35 }
 0x329   : > { %v1233_v61 = vpop.xlane.xlu0 %1232 }
 0x32a   : > { %v1240_v62 = vmul.f32 0.0078125, %v1233_v61  ;;  %v1326_v61 = vld [vmem:[%s2694_s13] sm:$0x3] }
 0x32b   : > { %v1235_v63 = vpop.xlane.xlu1 %1234 }
 0x32c   : > { %v1241_v0 = vmul.f32 0.0078125, %v1235_v63  ;;  %v1260_v2 = vmul.f32 %v1240_v62, %v1240_v62  ;;  %v1280_v26 = vsub.f32 %v2488_v23, %v1240_v62  ;;  %v1334_v62 = vsub.s32 1, %v1329_v59 }
 0x32d   : > { %v1249_v1 = vpop.xlane.xlu0 %1248  ;;  %v1331_v63 = vrot.slane %v1326_v61, %v1330_v60 }
 0x32e   : > { %v1256_v3 = vmul.f32 0.0078125, %v1249_v1  ;;  %v1261_v5 = vmul.f32 %v1241_v0, %v1241_v0  ;;  %v1281_v38 = vsub.f32 %v2491_v25, %v1241_v0  ;;  %v1335_v0 = vrot.slane %v1326_v61, %v1334_v62 }
 0x32f   : > { %v1251_v4 = vpop.xlane.xlu1 %1250 }
 0x330   : > { %v1264_v6 = vsub.f32 %v1256_v3, %v1260_v2  ;;  %v1257_v7 = vmul.f32 0.0078125, %v1251_v4 }
 0x331   : > { %v1237_v8 = vpop.xlane.xlu0 %1236 }
 0x332   : > { %v1268_v9 = vmax.f32 %v1264_v6, 0.0  ;;  %v1265_v10 = vsub.f32 %v1257_v7, %v1261_v5  ;;  %v1242_v11 = vmul.f32 0.0078125, %v1237_v8 }
 0x333   : > { %v1239_v12 = vpop.xlane.xlu1 %1238 }
 0x334   : > { %v1272_v13 = vadd.f32 1e-05, %v1268_v9  ;;  %v1269_v14 = vmax.f32 %v1265_v10, 0.0  ;;  %v1243_v15 = vmul.f32 0.0078125, %v1239_v12  ;;  %v1262_v18 = vmul.f32 %v1242_v11, %v1242_v11 }
 0x335   : > { %v1253_v16 = vpop.xlane.xlu0 %1252  ;;  %v1282_v45 = vsub.f32 %v2498_v33, %v1242_v11 }
 0x336   : > { %2195 = vrsqrt.f32 %v1272_v13  ;;  %v1273_v17 = vadd.f32 1e-05, %v1269_v14  ;;  %v1258_v19 = vmul.f32 0.0078125, %v1253_v16  ;;  %v1263_v21 = vmul.f32 %v1243_v15, %v1243_v15 }
 0x337   : > { %v1255_v20 = vpop.xlane.xlu1 %1254  ;;  %v1283_v47 = vsub.f32 %v2501_v30, %v1243_v15  ;;  %v2166_v30 = vld [vmem:[%s2695_s14 + $0x28] sm:$0xff]  }
 0x338   : > { %2197 = vrsqrt.f32 %v1273_v17  ;;  %v1266_v22 = vsub.f32 %v1258_v19, %v1262_v18  ;;  %v1259_v27 = vmul.f32 0.0078125, %v1255_v20  ;;  %2026 = vmatpush3.bf16.msra.mxu0 %v2166_v30 }
 0x339   : > { %2027 = vmatprep.subr.bf16.mxu0 %v2167_v55 }
 0x33a   : > { %v1270_v28 = vmax.f32 %v1266_v22, 0.0  ;;  %v1267_v31 = vsub.f32 %v1259_v27, %v1263_v21 }
 0x33c   : > { %v1274_v32 = vadd.f32 1e-05, %v1270_v28  ;;  %v1271_v34 = vmax.f32 %v1267_v31, 0.0 }
 0x33e   : > { %2199 = vrsqrt.f32 %v1274_v32  ;;  %v1275_v35 = vadd.f32 1e-05, %v1271_v34 }
 0x340   : > { %v2196_v36 = vpop.eup %2195  ;;  %2201 = vrsqrt.f32 %v1275_v35 }
 0x341   : > { %v1284_v39 = vmul.f32 %v2196_v36, %v1280_v26  ;;  %v1968_v36 = vld [vmem:[%s2696_s15] ss:$0 sm:$0xff] }
 0x342   : > { %v2198_v40 = vpop.eup %2197 }
 0x343   : > { %v1285_v41 = vmul.f32 %v2198_v40, %v1281_v38  ;;  %v1294_v42 = vmul.f32 %v1950_v37, %v1284_v39 }
 0x345   : > { %v1295_v44 = vmul.f32 %v1950_v37, %v1285_v41  ;;  %v2599_v23 = vadd.f32 %v1951_v43, %v1294_v42 }
 0x347   : > { %v2601_v46 = vadd.f32 %v1951_v43, %v1295_v44 }
 0x348   : > { %v2200_v29 = vpop.eup %2199 }
 0x349   : > { %v1308_v25 = vpack.c.bf16 %v2601_v46, %v2599_v23  ;;  %v1286_v24 = vmul.f32 %v2200_v29, %v1282_v45 }
 0x34a   : > { %v2202_v49 = vpop.eup %2201 }
 0x34b   : > { %1451 = vmatmul.mubr.bf16.vlgmr.msra.gmra.mrb[4].mxu1 %v1308_v25  ;;  %v1287_v50 = vmul.f32 %v2202_v49, %v1283_v47  ;;  %v1296_v51 = vmul.f32 %v1950_v37, %v1286_v24 }
 0x34c   : > { %1460 = vmatprep.mubr.bf16.mxu1 %v2235_v48  ;;  %v2168_v48 = vld [vmem:[%s2695_s14 + $0x30] sm:$0xff]  }
 0x34d   : > { %v1297_v52 = vmul.f32 %v1950_v37, %v1287_v50  ;;  %v2607_v53 = vadd.f32 %v1951_v43, %v1296_v51  ;;  %2028 = vmatpush3.bf16.msra.mxu0 %v2168_v48 }
 0x34e   : > { %2029 = vmatprep.subr.bf16.mxu0 %v2169_v56 }
 0x34f   : > { %v2609_v33 = vadd.f32 %v1951_v43, %v1297_v52 }
 0x351   : > { %v1309_v54 = vpack.c.bf16 %v2609_v33, %v2607_v53  ;;  %2030 = vmatpush3.bf16.msra.mxu0 %v2170_v57 }
 0x353   : > { %1461 = vmatmul.mubr.bf16.gmra.mrb[8].mxu1 %v1309_v54 }
 0x41e   : > { %v1452_v1 = vpop.f32.mrb[4].mxu1 }
 0x41f   : > { %v1453_v2 = vadd.f32 %v1452_v1, %v1331_v63  ;;  %v1454_v3 = vpop.f32.mrb[5].mxu1 }
 0x420   : > { %v1455_v4 = vadd.f32 %v1454_v3, %v1335_v0  ;;  %v1456_v5 = vpop.f32.mrb[6].mxu1 }
 0x421   : > { %v1457_v6 = vadd.f32 %v1456_v5, %v1331_v63  ;;  %v1458_v7 = vpop.f32.mrb[7].mxu1  ;;  %v1471_v9 = vmax.f32 %v1453_v2, 0.0 }
 0x422   : > { %v1459_v8 = vadd.f32 %v1458_v7, %v1335_v0  ;;  %v1472_v11 = vmax.f32 %v1455_v4, 0.0 }
 0x423   : > { %v1473_v10 = vmax.f32 %v1457_v6, 0.0 }
 0x424   : > { %v1474_v12 = vmax.f32 %v1459_v8, 0.0 }
 0x425   : > { %v1479_v13 = vpack.c.bf16 %v1473_v10, %v1471_v9 }
 0x426   : > { %v1480_v14 = vpack.c.bf16 %v1474_v12, %v1472_v11  ;;  %v1462_v15 = vpop.f32.mrb[8].mxu1 }
 0x427   : > { %v1463_v16 = vadd.f32 %v1462_v15, %v1331_v63  ;;  %v1464_v17 = vpop.f32.mrb[9].mxu1 }
 0x428   : > { %v1465_v18 = vadd.f32 %v1464_v17, %v1335_v0  ;;  %v1466_v19 = vpop.f32.mrb[10].mxu1  ;;  %1650 = vmatprep.mubr.bf16.mxu0 %v1480_v14 }
 0x429   : > { %v1467_v20 = vadd.f32 %v1466_v19, %v1331_v63  ;;  %v1468_v21 = vpop.f32.mrb[11].mxu1  ;;  %1651 = vmatmul.mubr.bf16.vlgmr.msra.gmra.mrb[8].mxu0 %v1479_v13  ;;  %v1475_v27 = vmax.f32 %v1463_v16, 0.0 }
 0x42a   : > { %v1469_v22 = vadd.f32 %v1468_v21, %v1335_v0  ;;  %v1476_v31 = vmax.f32 %v1465_v18, 0.0 }
 0x42b   : > { %v1477_v28 = vmax.f32 %v1467_v20, 0.0 }
 0x42c   : > { %v1478_v32 = vmax.f32 %v1469_v22, 0.0 }
 0x42d   : > { %v1481_v34 = vpack.c.bf16 %v1477_v28, %v1475_v27  ;;  %v1985_v28 = vld [vmem:[%s2699_s18] ss:$0 sm:$0xff] }
 0x42e   : > { %v1482_v35 = vpack.c.bf16 %v1478_v32, %v1476_v31 }
 0x430   : > { %1658 = vmatprep.mubr.bf16.mxu0 %v1482_v35  ;;  %v1986_v35 = vld [vmem:[%s2700_s19] ss:$0 sm:$0xff] }
 0x431   : > { %1659 = vmatmul.mubr.bf16.gmra.mrb[12].mxu0 %v1481_v34 }
 0x4fc   : > { %v2031_v26 = vpop.f32.mrb[8].mxu0 }
 0x4fd   : > { %v2032_v37 = vpop.f32.mrb[9].mxu0 }
 0x4fe   : > { %v2033_v38 = vadd.f32 %v2032_v37, %v2031_v26  ;;  %v2034_v39 = vpop.f32.mrb[10].mxu0 }
 0x4ff   : > { %v2035_v40 = vpop.f32.mrb[11].mxu0 }
 0x500   : > { %v1653_v41 = vadd.f32 %v2033_v38, %v1968_v36  ;;  %v2036_v42 = vadd.f32 %v2035_v40, %v2034_v39 }
 0x502   : > { %v1656_v43 = vadd.f32 %v2036_v42, %v1968_v36  ;;  %v2635_v44 = vadd.f32 %v1653_v41, %v2599_v23 }
 0x504   : > { %1673 = vadd.xlane.f32.xlu0 %v2635_v44  ;;  %v2037_v45 = vpop.f32.mrb[12].mxu0  ;;  %v2639_v29 = vadd.f32 %v1656_v43, %v2601_v46  ;;  %v1685_v49 = vmul.f32 %v2635_v44, %v2635_v44 }
 0x505   : > { %v2038_v47 = vpop.f32.mrb[13].mxu0 }
 0x506   : > { %v2039_v25 = vadd.f32 %v2038_v47, %v2037_v45  ;;  %1675 = vadd.xlane.f32.xlu1 %v2639_v29  ;;  %v2040_v24 = vpop.f32.mrb[14].mxu0  ;;  %v1686_v23 = vmul.f32 %v2639_v29, %v2639_v29 }
 0x507   : > { %v2041_v50 = vpop.f32.mrb[15].mxu0 }
 0x508   : > { %v1661_v51 = vadd.f32 %v2039_v25, %v1968_v36  ;;  %v2042_v52 = vadd.f32 %v2041_v50, %v2040_v24  ;;  %1689 = vadd.xlane.f32.xlu0 %v1685_v49 }
 0x50a   : > { %v1664_v54 = vadd.f32 %v2042_v52, %v1968_v36  ;;  %1691 = vadd.xlane.f32.xlu1 %v1686_v23  ;;  %v2647_v46 = vadd.f32 %v1661_v51, %v2607_v53 }
 0x50c   : > { %1677 = vadd.xlane.f32.xlu0 %v2647_v46  ;;  %v2651_v30 = vadd.f32 %v1664_v54, %v2609_v33  ;;  %v1687_v55 = vmul.f32 %v2647_v46, %v2647_v46 }
 0x50e   : > { %1679 = vadd.xlane.f32.xlu1 %v2651_v30  ;;  %v1688_v48 = vmul.f32 %v2651_v30, %v2651_v30 }
 0x510   : > { %1693 = vadd.xlane.f32.xlu0 %v1687_v55 }
 0x512   : > { %1695 = vadd.xlane.f32.xlu1 %v1688_v48 }
 0x591   : > { %v1674_v56 = vpop.xlane.xlu0 %1673 }
 0x592   : > { %v1681_v57 = vmul.f32 0.0078125, %v1674_v56 }
 0x593   : > { %v1676_v58 = vpop.xlane.xlu1 %1675 }
 0x594   : > { %v1682_v53 = vmul.f32 0.0078125, %v1676_v58  ;;  %v1701_v60 = vmul.f32 %v1681_v57, %v1681_v57  ;;  %v1721_v22 = vsub.f32 %v2635_v44, %v1681_v57 }
 0x595   : > { %v1690_v59 = vpop.xlane.xlu0 %1689 }
 0x596   : > { %v1697_v61 = vmul.f32 0.0078125, %v1690_v59  ;;  %v1702_v33 = vmul.f32 %v1682_v53, %v1682_v53  ;;  %v1722_v31 = vsub.f32 %v2639_v29, %v1682_v53 }
 0x597   : > { %v1692_v62 = vpop.xlane.xlu1 %1691 }
 0x598   : > { %v1705_v63 = vsub.f32 %v1697_v61, %v1701_v60  ;;  %v1698_v0 = vmul.f32 0.0078125, %v1692_v62 }
 0x599   : > { %v1678_v1 = vpop.xlane.xlu0 %1677 }
 0x59a   : > { %v1709_v2 = vmax.f32 %v1705_v63, 0.0  ;;  %v1706_v3 = vsub.f32 %v1698_v0, %v1702_v33  ;;  %v1683_v4 = vmul.f32 0.0078125, %v1678_v1 }
 0x59b   : > { %v1680_v5 = vpop.xlane.xlu1 %1679 }
 0x59c   : > { %v1713_v6 = vadd.f32 1e-05, %v1709_v2  ;;  %v1710_v7 = vmax.f32 %v1706_v3, 0.0  ;;  %v1684_v8 = vmul.f32 0.0078125, %v1680_v5  ;;  %v1703_v11 = vmul.f32 %v1683_v4, %v1683_v4 }
 0x59d   : > { %v1694_v9 = vpop.xlane.xlu0 %1693  ;;  %v1723_v40 = vsub.f32 %v2647_v46, %v1683_v4 }
 0x59e   : > { %2203 = vrsqrt.f32 %v1713_v6  ;;  %v1714_v10 = vadd.f32 1e-05, %v1710_v7  ;;  %v1699_v12 = vmul.f32 0.0078125, %v1694_v9  ;;  %v1704_v14 = vmul.f32 %v1684_v8, %v1684_v8 }
 0x59f   : > { %v1696_v13 = vpop.xlane.xlu1 %1695  ;;  %v1724_v42 = vsub.f32 %v2651_v30, %v1684_v8 }
 0x5a0   : > { %2205 = vrsqrt.f32 %v1714_v10  ;;  %v1707_v15 = vsub.f32 %v1699_v12, %v1703_v11  ;;  %v1700_v16 = vmul.f32 0.0078125, %v1696_v13 }
 0x5a2   : > { %v1711_v17 = vmax.f32 %v1707_v15, 0.0  ;;  %v1708_v18 = vsub.f32 %v1700_v16, %v1704_v14 }
 0x5a4   : > { %v1715_v19 = vadd.f32 1e-05, %v1711_v17  ;;  %v1712_v20 = vmax.f32 %v1708_v18, 0.0 }
 0x5a6   : > { %2207 = vrsqrt.f32 %v1715_v19  ;;  %v1716_v21 = vadd.f32 1e-05, %v1712_v20 }
 0x5a8   : > { %v2204_v27 = vpop.eup %2203  ;;  %2209 = vrsqrt.f32 %v1716_v21 }
 0x5a9   : > { %v1725_v32 = vmul.f32 %v2204_v27, %v1721_v22 }
 0x5aa   : > { %v2206_v34 = vpop.eup %2205 }
 0x5ab   : > { %v1735_v26 = vmul.f32 %v1985_v28, %v1725_v32  ;;  %v1726_v36 = vmul.f32 %v2206_v34, %v1722_v31 }
 0x5ad   : > { %v1745_v37 = vadd.f32 %v1986_v35, %v1735_v26  ;;  %v1736_v38 = vmul.f32 %v1985_v28, %v1726_v36 }
 0x5af   : > { %1749 = vst [vmem:[%s778_s1] sm:$0xff] %v1745_v37  ;;  %v1746_v39 = vadd.f32 %v1986_v35, %v1736_v38 }
 0x5b0   : > { %v2208_v41 = vpop.eup %2207 }
 0x5b1   : > { %1750 = vst [vmem:[%s778_s1 + $0x8] sm:$0xff] %v1746_v39  ;;  %v1727_v43 = vmul.f32 %v2208_v41, %v1723_v40 }
 0x5b2   : > { %v2210_v44 = vpop.eup %2209 }
 0x5b3   : > { %v1737_v45 = vmul.f32 %v1985_v28, %v1727_v43  ;;  %v1728_v29 = vmul.f32 %v2210_v44, %v1724_v42 }
 0x5b5   : > { %v1747_v47 = vadd.f32 %v1986_v35, %v1737_v45  ;;  %v1738_v25 = vmul.f32 %v1985_v28, %v1728_v29 }
 0x5b7   : > { %1751 = vst [vmem:[%s778_s1 + $0x10] sm:$0xff] %v1747_v47  ;;  %v1748_v24 = vadd.f32 %v1986_v35, %v1738_v25 }
 0x5b9   : > { %1752 = vst [vmem:[%s778_s1 + $0x18] sm:$0xff] %v1748_v24 }
 0x5ba PF: > { %s30_s23 = sadd.s32 1, %s2233_s23   ;;  %s2719_s1 = sld [smem:[#allocation2_spill]] }
 0x5bb   : > { %p27_p5 = scmp.ge.s32.totalorder %s30_s23, 6   ;;  %s2720_s22 = sld [smem:[#allocation3_spill]] }
 0x5bd   :  { %29 = sbr.rel (!%p27_p5) target bundleno = 7 (0x7), region = 145 }

</bundles_post_ra>
